<compile_context>
chip_gen: v5e
topology: v5e:2x2
jax: 0.10.0
libtpu: 0.0.40
codegen_flags: <defaults>
</compile_context>

<pallas_src>
import functools
import math

import jax
import jax.numpy as jnp
from jax import lax
from jax.experimental import pallas as pl
from jax.experimental.pallas import tpu as pltpu


def _gelu_exact(x):
    # PyTorch F.gelu default = exact (erf-based) gelu.
    return 0.5 * x * (1.0 + lax.erf(x * (1.0 / math.sqrt(2.0))))


def _policy_kernel(h_dim, a_dim, mm_dtype,
                   o_ref,
                   w12_ref, b12_ref,
                   w3_ref, b3_ref,
                   w4_ref, b4_ref,
                   w56_ref, b56_ref,
                   out_ref):
    # Activations are (feature, batch): batch on the 128-lane axis.
    x = o_ref[...].astype(mm_dtype)                              # (o_dim, TB)

    # Fused linear1 (eqi, no bias) + linear2 (reg, bias) in one MXU pass.
    f12 = jnp.dot(w12_ref[...], x,
                  preferred_element_type=jnp.float32) + b12_ref[...]  # (2h, TB)
    eqi_feature = f12[:h_dim, :]          # sublane slice (8-aligned offsets)
    reg_feature = f12[h_dim:, :]

    # Sign multiplier from the summed equivariant feature (sublane reduce).
    source = jnp.sum(eqi_feature, axis=0, keepdims=True)         # (1, TB)
    multiplier = jnp.where(source < 0.0, -1.0, 1.0)              # (1, TB)

    layer = _gelu_exact(jnp.abs(eqi_feature) + reg_feature)      # (h, TB) f32

    layer = _gelu_exact(
        jnp.dot(w3_ref[...], layer.astype(mm_dtype),
                preferred_element_type=jnp.float32) + b3_ref[...])
    layer = _gelu_exact(
        jnp.dot(w4_ref[...], layer.astype(mm_dtype),
                preferred_element_type=jnp.float32) + b4_ref[...])

    # Fused head: one matmul producing [mu ; log_sigma] rows, lane-dense store.
    head = jnp.dot(w56_ref[...], layer.astype(mm_dtype),
                   preferred_element_type=jnp.float32) + b56_ref[...]  # (2a, TB)
    row = lax.broadcasted_iota(jnp.int32, head.shape, 0)
    out = jnp.where(row < a_dim,
                    head * multiplier,                 # mu rows
                    jnp.clip(head, -20.0, 2.0))        # log_sigma rows
    out_ref[...] = out.astype(out_ref.dtype)


def fuse_params(params, eqi_idx, reg_idx, o_dim, matmul_dtype=jnp.float32):
    """One-time prep: fold the column gather into the first-layer weight,
    concatenate the two head weights/biases, and transpose everything to the
    batch-on-lanes (out_features, in_features) layout the kernel consumes."""
    h_dim = params["w1"].shape[1]
    w12 = jnp.zeros((o_dim, 2 * h_dim), jnp.float32)
    w12 = w12.at[eqi_idx, :h_dim].set(params["w1"])
    w12 = w12.at[reg_idx, h_dim:].set(params["w2"])
    b12 = jnp.concatenate(
        [jnp.zeros((1, h_dim), jnp.float32), params["b2"]], axis=1)
    w56 = jnp.concatenate([params["w5"], params["w6"]], axis=1)
    b56 = jnp.concatenate([params["b5"], params["b6"]], axis=1)
    md = matmul_dtype
    return {
        "w12_t": w12.T.astype(md), "b12_t": b12.T.astype(jnp.float32),
        "w3_t": params["w3"].T.astype(md), "b3_t": params["b3"].T.astype(jnp.float32),
        "w4_t": params["w4"].T.astype(md), "b4_t": params["b4"].T.astype(jnp.float32),
        "w56_t": w56.T.astype(md), "b56_t": b56.T.astype(jnp.float32),
    }


def _round_up(x, m):
    return ((x + m - 1) // m) * m


def _vmem_cap_bytes():
    """Generation-aware VMEM ceiling (3/4 of physical per-TC VMEM)."""
    try:
        cap = int(pltpu.get_tpu_info().vmem_capacity_bytes)
    except Exception:
        cap = 64 * 1024 * 1024      # conservative fallback (v7x physical)
    return (cap * 3) // 4


def _choose_tile(B, tb_max):
    """Pick (padded_B, tb): lane-aligned (128) batch tile.

    Single tile for tiny batches; otherwise cap tb at ~padded_B/2 so the
    grid has >= 2 steps and the 'parallel' batch axis shards across v7x's
    two TensorCores; large batches use tb_max-sized tiles."""
    padded_B = _round_up(max(B, 1), 128)
    if padded_B <= 128:
        return padded_B, padded_B
    tb = min(tb_max, _round_up(padded_B // 2, 128))
    tb = max(tb, 128)
    padded_B = _round_up(padded_B, tb)
    return padded_B, tb


def sie_gaussian_policy_forward(o, fused, a_dim, *, tb_max=8192):
    """Pallas implementation of SIEGaussianPolicy.forward.

    o: (B, o_dim) float32.  Returns (mu, log_sigma), each (B, a_dim)."""
    B, o_dim = o.shape
    h2 = fused["w12_t"].shape[0]        # 2 * h_dim
    h_dim = h2 // 2
    mm_dtype = fused["w3_t"].dtype

    padded_B, tb = _choose_tile(B, tb_max)
    grid = (padded_B // tb,)

    # Batch-on-lanes: observations fed to the kernel as (o_dim, padded_B).
    o_t = jnp.transpose(o)
    if padded_B != B:
        o_t = jnp.pad(o_t, ((0, 0), (0, padded_B - B)))

    def resident(shape):
        return pl.BlockSpec(shape, lambda i: (0, 0))

    in_specs = [
        pl.BlockSpec((o_dim, tb), lambda i: (0, i)),               # o^T tile
        resident((h2, o_dim)), resident((h2, 1)),                  # w12, b12
        resident((h_dim, h_dim)), resident((h_dim, 1)),            # w3, b3
        resident((h_dim, h_dim)), resident((h_dim, 1)),            # w4, b4
        resident((2 * a_dim, h_dim)), resident((2 * a_dim, 1)),    # w56, b56
    ]
    out_specs = pl.BlockSpec((2 * a_dim, tb), lambda i: (0, i))

    # VMEM budget: double-buffered activation/output tiles + resident weights
    # + in-kernel temporaries; capped generation-aware (v7x 64 MiB physical).
    weight_bytes = sum(int(v.size) * v.dtype.itemsize for v in fused.values())
    tile_bytes = 4 * tb * (2 * o_dim + 2 * 2 * a_dim + 8 * h2)
    vmem_limit = int(min(max(tile_bytes + 2 * weight_bytes, 4 * 1024 * 1024),
                         _vmem_cap_bytes()))

    out = pl.pallas_call(
        functools.partial(_policy_kernel, h_dim, a_dim, mm_dtype),
        out_shape=jax.ShapeDtypeStruct((2 * a_dim, padded_B), jnp.float32),
        grid=grid,
        in_specs=in_specs,
        out_specs=out_specs,
        compiler_params=pltpu.CompilerParams(
            dimension_semantics=("parallel",),
            vmem_limit_bytes=vmem_limit),
    )(o_t, fused["w12_t"], fused["b12_t"], fused["w3_t"], fused["b3_t"],
      fused["w4_t"], fused["b4_t"], fused["w56_t"], fused["b56_t"])

    mu = out[:a_dim, :B].T
    log_sigma = out[a_dim:, :B].T
    return mu, log_sigma


def init_params(key, eqi_o_dim, reg_o_dim, h_dim, a_dim):
    """Xavier-uniform init (weights_init_ analogue).

    Weights stored (in, out); biases as (1, out) — fuse_params transposes."""
    def xavier(key, fan_in, fan_out):
        limit = math.sqrt(6.0 / (fan_in + fan_out))
        return jax.random.uniform(key, (fan_in, fan_out), jnp.float32,
                                  minval=-limit, maxval=limit)

    ks = jax.random.split(key, 6)
    return {
        "w1": xavier(ks[0], eqi_o_dim, h_dim),
        "w2": xavier(ks[1], reg_o_dim, h_dim),
        "b2": jnp.zeros((1, h_dim), jnp.float32),
        "w3": xavier(ks[2], h_dim, h_dim),
        "b3": jnp.zeros((1, h_dim), jnp.float32),
        "w4": xavier(ks[3], h_dim, h_dim),
        "b4": jnp.zeros((1, h_dim), jnp.float32),
        "w5": xavier(ks[4], h_dim, a_dim),
        "b5": jnp.zeros((1, a_dim), jnp.float32),
        "w6": xavier(ks[5], h_dim, a_dim),
        "b6": jnp.zeros((1, a_dim), jnp.float32),
    }


def reference_forward(o, params, eqi_idx, reg_idx):
    """Pure-JAX reference for correctness checking."""
    eqi = jnp.take(o, eqi_idx, axis=1)
    reg = jnp.take(o, reg_idx, axis=1)
    eqi_feature = eqi @ params["w1"]
    source = jnp.sum(eqi_feature, axis=1, keepdims=True)
    multiplier = jnp.where(source < 0.0, -1.0, 1.0)
    reg_feature = reg @ params["w2"] + params["b2"]
    layer = jax.nn.gelu(jnp.abs(eqi_feature) + reg_feature, approximate=False)
    layer = jax.nn.gelu(layer @ params["w3"] + params["b3"], approximate=False)
    layer = jax.nn.gelu(layer @ params["w4"] + params["b4"], approximate=False)
    mu = (layer @ params["w5"] + params["b5"]) * multiplier
    log_sigma = jnp.clip(layer @ params["w6"] + params["b6"], -20.0, 2.0)
    return mu, log_sigma


if __name__ == "__main__":
    key = jax.random.PRNGKey(0)
    k_obs, k_par = jax.random.split(key)

    # Small shapes consistent with the module: o_dim=16 observation split into
    # 8 equivariant + 8 regular indices, hidden=32, a_dim=4, batch=2.
    B, o_dim, h_dim, a_dim = 2, 16, 32, 4
    eqi_idx = jnp.arange(0, 8, dtype=jnp.int32)
    reg_idx = jnp.arange(8, 16, dtype=jnp.int32)

    o = jax.random.normal(k_obs, (B, o_dim), jnp.float32)
    params = init_params(k_par, eqi_idx.shape[0], reg_idx.shape[0],
                         h_dim, a_dim)
    # matmul_dtype=jnp.bfloat16 is supported (MXU-native on all generations);
    # default f32 keeps exact parity with the PyTorch module at 1e-5.
    fused = fuse_params(params, eqi_idx, reg_idx, o_dim)

    mu, log_sigma = sie_gaussian_policy_forward(o, fused, a_dim)
    mu = jax.block_until_ready(mu)
    log_sigma = jax.block_until_ready(log_sigma)

    mu_ref, ls_ref = reference_forward(o, params, eqi_idx, reg_idx)
    assert mu.shape == (B, a_dim) and log_sigma.shape == (B, a_dim)
    assert jnp.allclose(mu, mu_ref, atol=1e-5, rtol=1e-5)
    assert jnp.allclose(log_sigma, ls_ref, atol=1e-5, rtol=1e-5)

    # TODO(synk): SIEGaussianPolicy.sample (Normal.rsample / tanh log-prob) is
    # not part of forward and is left to plain JAX.
    print("KERNEL_OK")
</pallas_src>

<mosaic_0001>
module attributes {stable_mosaic.version = 11 : i64} {
  func.func @_policy_kernel(%arg0: i32, %arg1: memref<16x128xf32, #tpu.memory_space<vmem>>, %arg2: memref<64x16xf32, #tpu.memory_space<vmem>>, %arg3: memref<64x1xf32, #tpu.memory_space<vmem>>, %arg4: memref<32x32xf32, #tpu.memory_space<vmem>>, %arg5: memref<32x1xf32, #tpu.memory_space<vmem>>, %arg6: memref<32x32xf32, #tpu.memory_space<vmem>>, %arg7: memref<32x1xf32, #tpu.memory_space<vmem>>, %arg8: memref<8x32xf32, #tpu.memory_space<vmem>>, %arg9: memref<8x1xf32, #tpu.memory_space<vmem>>, %arg10: memref<8x128xf32, #tpu.memory_space<vmem>>) attributes {dimension_semantics = [#tpu.dimension_semantics<parallel>], iteration_bounds = array<i64: 1>, scalar_prefetch = 0 : i64, scratch_operands = 0 : i64, tpu.core_type = #tpu.core_type<tc>, window_params = [{transform_indices = @transform_0, window_bounds = array<i64: 16, 128>}, {pipeline_mode = #tpu.pipeline_mode<synchronous>, transform_indices = @transform_1, window_bounds = array<i64: 64, 16>}, {pipeline_mode = #tpu.pipeline_mode<synchronous>, transform_indices = @transform_2, window_bounds = array<i64: 64, 1>}, {pipeline_mode = #tpu.pipeline_mode<synchronous>, transform_indices = @transform_3, window_bounds = array<i64: 32, 32>}, {pipeline_mode = #tpu.pipeline_mode<synchronous>, transform_indices = @transform_4, window_bounds = array<i64: 32, 1>}, {pipeline_mode = #tpu.pipeline_mode<synchronous>, transform_indices = @transform_5, window_bounds = array<i64: 32, 32>}, {pipeline_mode = #tpu.pipeline_mode<synchronous>, transform_indices = @transform_6, window_bounds = array<i64: 32, 1>}, {pipeline_mode = #tpu.pipeline_mode<synchronous>, transform_indices = @transform_7, window_bounds = array<i64: 8, 32>}, {pipeline_mode = #tpu.pipeline_mode<synchronous>, transform_indices = @transform_8, window_bounds = array<i64: 8, 1>}, {transform_indices = @transform_9, window_bounds = array<i64: 8, 128>}]} {
    %c0 = arith.constant 0 : index
    %c0_0 = arith.constant 0 : index
    %0 = vector.load %arg1[%c0, %c0_0] : memref<16x128xf32, #tpu.memory_space<vmem>>, vector<16x128xf32>
    %c0_1 = arith.constant 0 : index
    %c0_2 = arith.constant 0 : index
    %1 = vector.load %arg2[%c0_1, %c0_2] : memref<64x16xf32, #tpu.memory_space<vmem>>, vector<64x16xf32>
    %cst = arith.constant dense<0.000000e+00> : vector<64x128xf32>
    %2 = tpu.matmul %1, %0, %cst {dimension_numbers = #tpu.dot_dimension_numbers<[1], [0], [0], [1], [0, 0, 1, 1], [], []>} : vector<64x16xf32>, vector<16x128xf32>, vector<64x128xf32> -> vector<64x128xf32>
    %c0_3 = arith.constant 0 : index
    %c0_4 = arith.constant 0 : index
    %3 = vector.load %arg3[%c0_3, %c0_4] : memref<64x1xf32, #tpu.memory_space<vmem>>, vector<64x1xf32>
    %4 = vector.broadcast %3 : vector<64x1xf32> to vector<64x128xf32>
    %5 = arith.addf %2, %4 : vector<64x128xf32>
    %6 = vector.extract_strided_slice %5 {offsets = [0, 0], sizes = [32, 128], strides = [1, 1]} : vector<64x128xf32> to vector<32x128xf32>
    %7 = vector.extract_strided_slice %5 {offsets = [32, 0], sizes = [32, 128], strides = [1, 1]} : vector<64x128xf32> to vector<32x128xf32>
    %cst_5 = arith.constant dense<0.000000e+00> : vector<128xf32>
    %8 = vector.multi_reduction <add>, %6, %cst_5 [0] : vector<32x128xf32> to vector<128xf32>
    %9 = vector.shape_cast %8 : vector<128xf32> to vector<1x128xf32>
    %cst_6 = arith.constant 0.000000e+00 : f32
    %10 = vector.broadcast %cst_6 : f32 to vector<1x128xf32>
    %11 = arith.cmpf olt, %9, %10 : vector<1x128xf32>
    %cst_7 = arith.constant -1.000000e+00 : f32
    %cst_8 = arith.constant 1.000000e+00 : f32
    %12 = vector.broadcast %cst_7 : f32 to vector<1x128xf32>
    %13 = vector.broadcast %cst_8 : f32 to vector<1x128xf32>
    %14 = arith.select %11, %12, %13 : vector<1x128xi1>, vector<1x128xf32>
    %15 = math.absf %6 : vector<32x128xf32>
    %16 = arith.addf %15, %7 : vector<32x128xf32>
    %cst_9 = arith.constant 5.000000e-01 : f32
    %17 = vector.broadcast %cst_9 : f32 to vector<32x128xf32>
    %18 = arith.mulf %17, %16 : vector<32x128xf32>
    %cst_10 = arith.constant 0.707106769 : f32
    %19 = vector.broadcast %cst_10 : f32 to vector<32x128xf32>
    %20 = arith.mulf %16, %19 : vector<32x128xf32>
    %21 = math.erf %20 : vector<32x128xf32>
    %cst_11 = arith.constant 1.000000e+00 : f32
    %22 = vector.broadcast %cst_11 : f32 to vector<32x128xf32>
    %23 = arith.addf %22, %21 : vector<32x128xf32>
    %24 = arith.mulf %18, %23 : vector<32x128xf32>
    %c0_12 = arith.constant 0 : index
    %c0_13 = arith.constant 0 : index
    %25 = vector.load %arg4[%c0_12, %c0_13] : memref<32x32xf32, #tpu.memory_space<vmem>>, vector<32x32xf32>
    %cst_14 = arith.constant dense<0.000000e+00> : vector<32x128xf32>
    %26 = tpu.matmul %25, %24, %cst_14 {dimension_numbers = #tpu.dot_dimension_numbers<[1], [0], [0], [1], [0, 0, 1, 1], [], []>} : vector<32x32xf32>, vector<32x128xf32>, vector<32x128xf32> -> vector<32x128xf32>
    %c0_15 = arith.constant 0 : index
    %c0_16 = arith.constant 0 : index
    %27 = vector.load %arg5[%c0_15, %c0_16] : memref<32x1xf32, #tpu.memory_space<vmem>>, vector<32x1xf32>
    %28 = vector.broadcast %27 : vector<32x1xf32> to vector<32x128xf32>
    %29 = arith.addf %26, %28 : vector<32x128xf32>
    %cst_17 = arith.constant 5.000000e-01 : f32
    %30 = vector.broadcast %cst_17 : f32 to vector<32x128xf32>
    %31 = arith.mulf %30, %29 : vector<32x128xf32>
    %cst_18 = arith.constant 0.707106769 : f32
    %32 = vector.broadcast %cst_18 : f32 to vector<32x128xf32>
    %33 = arith.mulf %29, %32 : vector<32x128xf32>
    %34 = math.erf %33 : vector<32x128xf32>
    %cst_19 = arith.constant 1.000000e+00 : f32
    %35 = vector.broadcast %cst_19 : f32 to vector<32x128xf32>
    %36 = arith.addf %35, %34 : vector<32x128xf32>
    %37 = arith.mulf %31, %36 : vector<32x128xf32>
    %c0_20 = arith.constant 0 : index
    %c0_21 = arith.constant 0 : index
    %38 = vector.load %arg6[%c0_20, %c0_21] : memref<32x32xf32, #tpu.memory_space<vmem>>, vector<32x32xf32>
    %cst_22 = arith.constant dense<0.000000e+00> : vector<32x128xf32>
    %39 = tpu.matmul %38, %37, %cst_22 {dimension_numbers = #tpu.dot_dimension_numbers<[1], [0], [0], [1], [0, 0, 1, 1], [], []>} : vector<32x32xf32>, vector<32x128xf32>, vector<32x128xf32> -> vector<32x128xf32>
    %c0_23 = arith.constant 0 : index
    %c0_24 = arith.constant 0 : index
    %40 = vector.load %arg7[%c0_23, %c0_24] : memref<32x1xf32, #tpu.memory_space<vmem>>, vector<32x1xf32>
    %41 = vector.broadcast %40 : vector<32x1xf32> to vector<32x128xf32>
    %42 = arith.addf %39, %41 : vector<32x128xf32>
    %cst_25 = arith.constant 5.000000e-01 : f32
    %43 = vector.broadcast %cst_25 : f32 to vector<32x128xf32>
    %44 = arith.mulf %43, %42 : vector<32x128xf32>
    %cst_26 = arith.constant 0.707106769 : f32
    %45 = vector.broadcast %cst_26 : f32 to vector<32x128xf32>
    %46 = arith.mulf %42, %45 : vector<32x128xf32>
    %47 = math.erf %46 : vector<32x128xf32>
    %cst_27 = arith.constant 1.000000e+00 : f32
    %48 = vector.broadcast %cst_27 : f32 to vector<32x128xf32>
    %49 = arith.addf %48, %47 : vector<32x128xf32>
    %50 = arith.mulf %44, %49 : vector<32x128xf32>
    %c0_28 = arith.constant 0 : index
    %c0_29 = arith.constant 0 : index
    %51 = vector.load %arg8[%c0_28, %c0_29] : memref<8x32xf32, #tpu.memory_space<vmem>>, vector<8x32xf32>
    %cst_30 = arith.constant dense<0.000000e+00> : vector<8x128xf32>
    %52 = tpu.matmul %51, %50, %cst_30 {dimension_numbers = #tpu.dot_dimension_numbers<[1], [0], [0], [1], [0, 0, 1, 1], [], []>} : vector<8x32xf32>, vector<32x128xf32>, vector<8x128xf32> -> vector<8x128xf32>
    %c0_31 = arith.constant 0 : index
    %c0_32 = arith.constant 0 : index
    %53 = vector.load %arg9[%c0_31, %c0_32] : memref<8x1xf32, #tpu.memory_space<vmem>>, vector<8x1xf32>
    %54 = vector.broadcast %53 : vector<8x1xf32> to vector<8x128xf32>
    %55 = arith.addf %52, %54 : vector<8x128xf32>
    %56 = tpu.iota {dimensions = array<i32: 0>} : vector<8x128xi32>
    %c4_i32 = arith.constant 4 : i32
    %57 = vector.broadcast %c4_i32 : i32 to vector<8x128xi32>
    %58 = arith.cmpi slt, %56, %57 : vector<8x128xi32>
    %59 = vector.broadcast %14 : vector<1x128xf32> to vector<8x128xf32>
    %60 = arith.mulf %55, %59 : vector<8x128xf32>
    %cst_33 = arith.constant -2.000000e+01 : f32
    %cst_34 = arith.constant 2.000000e+00 : f32
    %61 = vector.broadcast %cst_33 : f32 to vector<8x128xf32>
    %62 = arith.maximumf %61, %55 : vector<8x128xf32>
    %63 = vector.broadcast %cst_34 : f32 to vector<8x128xf32>
    %64 = arith.minimumf %63, %62 : vector<8x128xf32>
    %65 = arith.select %58, %60, %64 : vector<8x128xi1>, vector<8x128xf32>
    %c0_35 = arith.constant 0 : index
    %c0_36 = arith.constant 0 : index
    %66 = vector.load %arg10[%c0_35, %c0_36] : memref<8x128xf32, #tpu.memory_space<vmem>>, vector<8x128xf32>
    tpu.vector_store %arg10[%c0_35, %c0_36], %65 {strides = array<i32>} : memref<8x128xf32, #tpu.memory_space<vmem>>, vector<8x128xf32>,
    return
  }
  func.func @transform_0(%arg0: i32) -> (i32, i32) {
    %c0_i32 = arith.constant 0 : i32
    %c0_i32_0 = arith.constant 0 : i32
    return %c0_i32, %arg0 : i32, i32
  }
  func.func @transform_1(%arg0: i32) -> (i32, i32) {
    %c0_i32 = arith.constant 0 : i32
    %c0_i32_0 = arith.constant 0 : i32
    %c0_i32_1 = arith.constant 0 : i32
    return %c0_i32, %c0_i32_0 : i32, i32
  }
  func.func @transform_2(%arg0: i32) -> (i32, i32) {
    %c0_i32 = arith.constant 0 : i32
    %c0_i32_0 = arith.constant 0 : i32
    %c0_i32_1 = arith.constant 0 : i32
    return %c0_i32, %c0_i32_0 : i32, i32
  }
  func.func @transform_3(%arg0: i32) -> (i32, i32) {
    %c0_i32 = arith.constant 0 : i32
    %c0_i32_0 = arith.constant 0 : i32
    %c0_i32_1 = arith.constant 0 : i32
    return %c0_i32, %c0_i32_0 : i32, i32
  }
  func.func @transform_4(%arg0: i32) -> (i32, i32) {
    %c0_i32 = arith.constant 0 : i32
    %c0_i32_0 = arith.constant 0 : i32
    %c0_i32_1 = arith.constant 0 : i32
    return %c0_i32, %c0_i32_0 : i32, i32
  }
  func.func @transform_5(%arg0: i32) -> (i32, i32) {
    %c0_i32 = arith.constant 0 : i32
    %c0_i32_0 = arith.constant 0 : i32
    %c0_i32_1 = arith.constant 0 : i32
    return %c0_i32, %c0_i32_0 : i32, i32
  }
  func.func @transform_6(%arg0: i32) -> (i32, i32) {
    %c0_i32 = arith.constant 0 : i32
    %c0_i32_0 = arith.constant 0 : i32
    %c0_i32_1 = arith.constant 0 : i32
    return %c0_i32, %c0_i32_0 : i32, i32
  }
  func.func @transform_7(%arg0: i32) -> (i32, i32) {
    %c0_i32 = arith.constant 0 : i32
    %c0_i32_0 = arith.constant 0 : i32
    %c0_i32_1 = arith.constant 0 : i32
    return %c0_i32, %c0_i32_0 : i32, i32
  }
  func.func @transform_8(%arg0: i32) -> (i32, i32) {
    %c0_i32 = arith.constant 0 : i32
    %c0_i32_0 = arith.constant 0 : i32
    %c0_i32_1 = arith.constant 0 : i32
    return %c0_i32, %c0_i32_0 : i32, i32
  }
  func.func @transform_9(%arg0: i32) -> (i32, i32) {
    %c0_i32 = arith.constant 0 : i32
    %c0_i32_0 = arith.constant 0 : i32
    return %c0_i32, %arg0 : i32, i32
  }
}

</mosaic_0001>

<bundles_post_ra>
// kernel: tpu_custom_call.1
= control target key start
LH: loop header
LB: loop body
LE: loop exit
PB: predicated region body
PF: predicated region fallthrough
CT: control target
= control target key end

     0   :  { %v984_v3 = vmov 0   ;;  %vm91_vm0 = vcmask 130048   ;;  %s1560_s0 = inlined_call_operand.vmem [shape: f32[16,128], index: 0, kind: input, shape index: {}]   ;;  %s1561_s1 = inlined_call_operand.vmem [shape: f32[64,16], index: 1, kind: input, shape index: {}]   ;;  %s1562_s2 = inlined_call_operand.vmem [shape: f32[64,1], index: 2, kind: input, shape index: {}]   ;;  %s1563_s3 = inlined_call_operand.vmem [shape: f32[32,32], index: 3, kind: input, shape index: {}]   ;;  %s1564_s4 = inlined_call_operand.vmem [shape: f32[32,1], index: 4, kind: input, shape index: {}]   ;;  %s1565_s5 = inlined_call_operand.vmem [shape: f32[32,32], index: 5, kind: input, shape index: {}]   ;;  %s1566_s6 = inlined_call_operand.vmem [shape: f32[32,1], index: 6, kind: input, shape index: {}]   ;;  %s1567_s7 = inlined_call_operand.vmem [shape: f32[8,32], index: 7, kind: input, shape index: {}]   ;;  %s1568_s8 = inlined_call_operand.vmem [shape: f32[8,1], index: 8, kind: input, shape index: {}]   ;;  %s1569_s9 = inlined_call_operand.hbm [shape: f32[8,128], index: 9, kind: output, shape index: {}]  }
   0x1   :  { %v34_v0 = vld [vmem:[%s1560_s0 + $0x8] sm:$0xff]  ;;  %v50_v1 = vld [vmem:[%s1562_s2 + $0x38] sm:$0xff]  ;;  %932 = vset.pattern.permute.xlu1 %v984_v3  ;;  %931 = vset.pattern.permute.xlu0 %v984_v3  ;;  %v33_v4 = vld [vmem:[%s1560_s0] sm:$0xff] }
   0x2   :  { %v46_v2 = vld [vmem:[%s1562_s2 + $0x18] sm:$0xff]  ;;  %130 = vmatpush.msra.mxu0 %v34_v0  ;;  %926 = vmatpush.msra.mxu3 %v34_v0  ;;  %v35_v5 = vld [vmem:[%s1561_s1] sm:$0xff]  ;;  %v40_v6 = vld [vmem:[%s1561_s1 + $0x28] sm:$0xff] }
   0x3   :  { %88 = vperm.xlu1 %932, %v50_v1   ;;  %68 = vperm.xlu0 %931, %v46_v2   ;;  %v49_v7 = vld [vmem:[%s1562_s2 + $0x30] sm:$0xff] }
   0x4   :  { %131 = vmatpush.msra.mxu0 %v33_v4  ;;  %927 = vmatpush.msra.mxu3 %v33_v4 }
   0x5   :  { %897 = vmatmul.msk.f32.vlgmr.msra.gmra.mxu0 %vm91_vm0, %v35_v5  ;;  %902 = vmatmul.msk.f32.vlgmr.msra.gmra.mxu3 %vm91_vm0, %v40_v6 }
   0x6   :  { %933 = vset.pattern.permute.xlu2 %v984_v3 }
   0x7   :  { %83 = vperm.xlu2 %933, %v49_v7  }
   0x8   :  { %14 = vsyncpa [#allocation3], 0  ;;  %v45_v8 = vld [vmem:[%s1562_s2 + $0x10] sm:$0xff]  ;;  %v44_v9 = vld [vmem:[%s1562_s2 + $0x8] sm:$0xff]  ;;  %s985_s28 = smov [#allocation2]   ;;  %s888_s10 = sshll.u32 %s1569_s9, 4  ;;  %s889_s10 = int_to_ptr.hbm [resolvable:$true] %s888_s10 }
   0x9   :  { %v36_v10 = vld [vmem:[%s1561_s1 + $0x8] sm:$0xff]  ;;  %v41_v11 = vld [vmem:[%s1561_s1 + $0x30] sm:$0xff]  ;;  %v43_v12 = vld [vmem:[%s1562_s2] sm:$0xff] }
   0xa   :  { %v48_v13 = vld [vmem:[%s1562_s2 + $0x28] sm:$0xff]  ;;  %v47_v14 = vld [vmem:[%s1562_s2 + $0x20] sm:$0xff]  ;;  %v37_v15 = vld [vmem:[%s1561_s1 + $0x10] sm:$0xff] }
   0xb   :  { %63 = vperm.xlu0 %931, %v45_v8   ;;  %58 = vperm.xlu1 %932, %v44_v9   ;;  %v42_v16 = vld [vmem:[%s1561_s1 + $0x38] sm:$0xff]  ;;  %v358_v18 = vld [vmem:[%s1564_s4 + $0x10] sm:$0xff]  ;;  %v357_v19 = vld [vmem:[%s1564_s4 + $0x8] sm:$0xff] }
   0xc   :  { %v359_v17 = vld [vmem:[%s1564_s4 + $0x18] sm:$0xff]  ;;  %v356_v21 = vld [vmem:[%s1564_s4] sm:$0xff]  ;;  %v604_v23 = vld [vmem:[%s1566_s6 + $0x10] sm:$0xff] }
   0xd   :  { %898 = vmatmul.msk.f32.gmra.mxu0 %vm91_vm0, %v36_v10  ;;  %903 = vmatmul.msk.f32.gmra.mxu3 %vm91_vm0, %v41_v11  ;;  %v38_v20 = vld [vmem:[%s1561_s1 + $0x18] sm:$0xff]  ;;  %v39_v24 = vld [vmem:[%s1561_s1 + $0x20] sm:$0xff]  ;;  %v603_v25 = vld [vmem:[%s1566_s6 + $0x8] sm:$0xff] }
   0xe   :  { %v605_v22 = vld [vmem:[%s1566_s6 + $0x18] sm:$0xff]  ;;  %v602_v26 = vld [vmem:[%s1566_s6] sm:$0xff] }
   0xf   :  { %53 = vperm.xlu2 %933, %v43_v12   ;;  %v844_v27 = vld [vmem:[%s1568_s8] sm:$0xff] }
  0x13   :  { %78 = vperm.xlu0 %931, %v48_v13   ;;  %73 = vperm.xlu1 %932, %v47_v14  }
  0x15   :  { %899 = vmatmul.msk.f32.gmra.mxu0 %vm91_vm0, %v37_v15  ;;  %904 = vmatmul.msk.f32.gmra.mxu3 %vm91_vm0, %v42_v16 }
  0x17   :  { %377 = vperm.xlu2 %933, %v359_v17  }
  0x1b   :  { %372 = vperm.xlu0 %931, %v358_v18   ;;  %367 = vperm.xlu1 %932, %v357_v19  }
  0x1d   :  { %900 = vmatmul.msk.f32.gmra.mxu0 %vm91_vm0, %v38_v20 }
  0x1f   :  { %362 = vperm.xlu2 %933, %v356_v21  }
  0x23   :  { %623 = vperm.xlu0 %931, %v605_v22   ;;  %618 = vperm.xlu1 %932, %v604_v23  }
  0x25   :  { %901 = vmatmul.msk.f32.gmra.mxu0 %vm91_vm0, %v39_v24 }
  0x27   :  { %613 = vperm.xlu2 %933, %v603_v25  }
  0x2b   :  { %608 = vperm.xlu0 %931, %v602_v26   ;;  %847 = vperm.xlu1 %932, %v844_v27  }
  0x61   :  { %v84_v30 = vpop.permute.xlu2 %83 }
  0x69   :  { %v54_v35 = vpop.permute.xlu2 %53 }
  0x75   :  { %v69_v28 = vpop.permute.xlu0 %68  ;;  %v89_v29 = vpop.permute.xlu1 %88 }
  0x7d   :  { %v64_v31 = vpop.permute.xlu0 %63  ;;  %v59_v34 = vpop.permute.xlu1 %58 }
  0x82   :  { %v133_v32 = vpop.f32.mrf.mxu0 }
  0x83   :  { %v134_v38 = vadd.f32 %v133_v32, %v54_v35 }
  0x85   :  { %v79_v36 = vpop.permute.xlu0 %78  ;;  %v74_v12 = vpop.permute.xlu1 %73  ;;  %v168_v16 = vand.u32 2147483647, %v134_v38 }
  0x88   :  { %v148_v33 = vpop.f32.mrf.mxu3 }
  0x89   :  { %v149_v39 = vadd.f32 %v148_v33, %v79_v36 }
  0x8a   :  { %v136_v37 = vpop.f32.mrf.mxu0 }
  0x8b   :  { %v137_v40 = vadd.f32 %v136_v37, %v59_v34 }
  0x8d   :  { %v157_v41 = vadd.f32 %v137_v40, %v134_v38  ;;  %v169_v42 = vand.u32 2147483647, %v137_v40 }
  0x8f   :  { %v1126_v43 = vadd.f32 %v169_v42, %v149_v39 }
  0x90   :  { %v151_v44 = vpop.f32.mrf.mxu3 }
  0x91   :  { %v1129_v45 = vmul.f32 0.70710677, %v1126_v43  ;;  %v152_v48 = vadd.f32 %v151_v44, %v84_v30 }
  0x92   :  { %v139_v46 = vpop.f32.mrf.mxu0 }
  0x93   :  { %v224_v47 = vmul.f32 %v1129_v45, %v1129_v45  ;;  %v140_v49 = vadd.f32 %v139_v46, %v64_v31 }
  0x95   :  { %v1133_v50 = vmin.f32 %v224_v47, 16.0  ;;  %v158_v51 = vadd.f32 %v157_v41, %v140_v49  ;;  %v170_v52 = vand.u32 2147483647, %v140_v49 }
  0x97   :  { %v1135_v53 = vadd.f32 %v170_v52, %v152_v48  ;;  %v237_v54 = vmul.f32 3.8918573e-05, %v1133_v50  ;;  %v226_v57 = vmul.f32 2.1237322e-06, %v1133_v50 }
  0x98   :  { %v154_v56 = vpop.f32.mrf.mxu3 }
  0x99   :  { %v1139_v55 = vmul.f32 0.70710677, %v1135_v53  ;;  %v238_v59 = vadd.f32 0.001143296, %v237_v54  ;;  %v155_v62 = vadd.f32 %v154_v56, %v89_v29  ;;  %v227_v3 = vadd.f32 0.00028619796, %v226_v57 }
  0x9a   :  { %v142_v58 = vpop.f32.mrf.mxu0 }
  0x9b   :  { %v264_v60 = vmul.f32 %v1139_v55, %v1139_v55  ;;  %v143_v61 = vadd.f32 %v142_v58, %v69_v28  ;;  %v239_v63 = vmul.f32 %v238_v59, %v1133_v50  ;;  %v228_v11 = vmul.f32 %v227_v3, %v1133_v50 }
  0x9d   :  { %v1145_v0 = vmin.f32 %v264_v60, 16.0  ;;  %v1147_v1 = vadd.f32 %v158_v51, %v143_v61  ;;  %v171_v2 = vand.u32 2147483647, %v143_v61  ;;  %v240_v4 = vadd.f32 0.014752088, %v239_v63 }
  0x9e   :  { %v229_v24 = vadd.f32 0.0036580483, %v228_v11 }
  0x9f   :  { %v1149_v5 = vadd.f32 %v171_v2, %v155_v62  ;;  %v266_v6 = vmul.f32 2.1237322e-06, %v1145_v0  ;;  %v277_v7 = vmul.f32 3.8918573e-05, %v1145_v0  ;;  %v241_v8 = vmul.f32 %v240_v4, %v1133_v50 }
  0xa0   :  { %v230_v36 = vmul.f32 %v229_v24, %v1133_v50 }
  0xa1   :  { %v1155_v9 = vmul.f32 0.70710677, %v1149_v5  ;;  %v267_v10 = vadd.f32 0.00028619796, %v266_v6  ;;  %v278_v14 = vadd.f32 0.001143296, %v277_v7 }
  0xa2   :  { %v145_v13 = vpop.f32.mrf.mxu0  ;;  %v242_v15 = vadd.f32 0.112945676, %v241_v8  ;;  %v231_v48 = vadd.f32 0.05243302, %v230_v36 }
  0xa3   :  { %v146_v17 = vadd.f32 %v145_v13, %v74_v12  ;;  %v304_v18 = vmul.f32 %v1155_v9, %v1155_v9  ;;  %v268_v19 = vmul.f32 %v267_v10, %v1145_v0  ;;  %v279_v20 = vmul.f32 %v278_v14, %v1145_v0 }
  0xa4   :  { %v243_v21 = vmul.f32 %v242_v15, %v1133_v50  ;;  %v232_v60 = vmul.f32 %v231_v48, %v1133_v50 }
  0xa5   :  { %v1163_v22 = vadd.f32 %v168_v16, %v146_v17  ;;  %v1165_v23 = vmin.f32 %v304_v18, 16.0  ;;  %v269_v25 = vadd.f32 0.0036580483, %v268_v19  ;;  %v280_v26 = vadd.f32 0.014752088, %v279_v20 }
  0xa6   :  { %v244_v27 = vadd.f32 0.4994258, %v243_v21  ;;  %v233_v11 = vadd.f32 0.18741608, %v232_v60 }
  0xa7   :  { %v1168_v28 = vmul.f32 0.70710677, %v1163_v22  ;;  %v306_v29 = vmul.f32 2.1237322e-06, %v1165_v23  ;;  %v317_v30 = vmul.f32 3.8918573e-05, %v1165_v23  ;;  %v281_v31 = vmul.f32 %v280_v26, %v1145_v0 }
  0xa8   :  { %v245_v32 = vmul.f32 %v244_v27, %v1133_v50  ;;  %v270_v37 = vmul.f32 %v269_v25, %v1145_v0  ;;  %v234_v24 = vmul.f32 %v233_v11, %v1133_v50 }
  0xa9   :  { %v184_v33 = vmul.f32 %v1168_v28, %v1168_v28  ;;  %v307_v34 = vadd.f32 0.00028619796, %v306_v29  ;;  %v318_v35 = vadd.f32 0.001143296, %v317_v30  ;;  %v282_v38 = vadd.f32 0.112945676, %v281_v31 }
  0xaa   :  { %v1178_v39 = vadd.f32 1.0, %v245_v32  ;;  %v271_v49 = vadd.f32 0.05243302, %v270_v37 }
  0xab   :  { %v1180_v40 = vmin.f32 %v184_v33, 16.0  ;;  %v308_v41 = vmul.f32 %v307_v34, %v1165_v23  ;;  %v319_v42 = vmul.f32 %v318_v35, %v1165_v23  ;;  %v283_v44 = vmul.f32 %v282_v38, %v1145_v0 }
  0xac   :  { %934 = vrcp.f32 %v1178_v39  ;;  %v272_v62 = vmul.f32 %v271_v49, %v1145_v0  ;;  %v256_v30 = vand.u32 2147483647, %v1178_v39  ;;  %v235_v35 = vadd.f32 1.1283791, %v234_v24 }
  0xad   :  { %v309_v46 = vadd.f32 0.0036580483, %v308_v41  ;;  %v320_v47 = vadd.f32 0.014752088, %v319_v42  ;;  %v284_v51 = vadd.f32 0.4994258, %v283_v44  ;;  %vm252_vm3 = vweird.f32 %v1178_v39 }
  0xae   :  { %v186_v54 = vmul.f32 2.1237322e-06, %v1180_v40  ;;  %v197_v58 = vmul.f32 3.8918573e-05, %v1180_v40  ;;  %v273_v10 = vadd.f32 0.18741608, %v272_v62 }
  0xaf   :  { %v321_v52 = vmul.f32 %v320_v47, %v1165_v23  ;;  %v310_v56 = vmul.f32 %v309_v46, %v1165_v23  ;;  %v285_v57 = vmul.f32 %v284_v51, %v1145_v0  ;;  %vm1217_vm4 = vcmp.eq.f32.partialorder %v256_v30, 8.507059e+37 }
  0xb0   :  { %v187_v2 = vadd.f32 0.00028619796, %v186_v54  ;;  %v198_v3 = vadd.f32 0.001143296, %v197_v58  ;;  %v274_v21 = vmul.f32 %v273_v10, %v1145_v0  ;;  %v258_v0 = vand.u32 2147483648, %v1178_v39 }
  0xb1   :  { %v322_v59 = vadd.f32 0.112945676, %v321_v52  ;;  %v286_v63 = vadd.f32 1.0, %v285_v57  ;;  %v311_v7 = vadd.f32 0.05243302, %v310_v56 }
  0xb2   :  { %v1192_v61 = vpop.eup %934  ;;  %v188_v12 = vmul.f32 %v187_v2, %v1180_v40  ;;  %v199_v13 = vmul.f32 %v198_v3, %v1180_v40  ;;  %v275_v33 = vadd.f32 1.1283791, %v274_v21 }
  0xb3   :  { %v323_v4 = vmul.f32 %v322_v59, %v1165_v23  ;;  %v248_v6 = vmul.f32 %v1192_v61, %v1178_v39  ;;  %936 = vrcp.f32 %v286_v63  ;;  %v312_v16 = vmul.f32 %v311_v7, %v1165_v23 }
  0xb4   :  { %v200_v17 = vadd.f32 0.014752088, %v199_v13  ;;  %v189_v19 = vadd.f32 0.0036580483, %v188_v12  ;;  %v298_v36 = vand.u32 2147483648, %v286_v63  ;;  %vm253_vm1 = vweird.f32 %v1192_v61 }
  0xb5   :  { %v324_v8 = vadd.f32 0.4994258, %v323_v4  ;;  %v249_v15 = vsub.f32 1.0, %v248_v6  ;;  %v313_v27 = vadd.f32 0.18741608, %v312_v16  ;;  %vm292_vm5 = vweird.f32 %v286_v63  ;;  %vm1222_vm6 = vmor %vm252_vm3, %vm253_vm1 }
  0xb6   :  { %v201_v25 = vmul.f32 %v200_v17, %v1180_v40  ;;  %v190_v31 = vmul.f32 %v189_v19, %v1180_v40  ;;  %v296_v42 = vand.u32 2147483647, %v286_v63  ;;  %v276_v54 = vmul.f32 %v275_v33, %v1139_v55 }
  0xb7   :  { %v325_v14 = vmul.f32 %v324_v8, %v1165_v23  ;;  %v250_v26 = vmul.f32 %v1192_v61, %v249_v15  ;;  %v314_v38 = vmul.f32 %v313_v27, %v1165_v23  ;;  %v259_v23 = vor.u32 1.1754944e-38, %v258_v0 }
  0xb8   :  { %v202_v32 = vadd.f32 0.112945676, %v201_v25  ;;  %v191_v47 = vadd.f32 0.05243302, %v190_v31  ;;  %v299_v56 = vor.u32 1.1754944e-38, %v298_v36  ;;  %vm297_vm8 = vcmp.eq.f32.partialorder %v296_v42, 8.507059e+37 }
  0xb9   :  { %v1202_v18 = vadd.f32 1.0, %v325_v14  ;;  %v937_v20 = vpop.eup %936  ;;  %v251_v50 = vadd.f32 %v1192_v61, %v250_v26  ;;  %v315_v58 = vadd.f32 1.1283791, %v314_v38  ;;  %v176_v42 = vmul.f32 0.5, %v1163_v22  ;;  %v354_v22 = vld [vmem:[%s1563_s3 + $0x10] sm:$0xff] }
  0xba   :  { %v288_v29 = vmul.f32 %v937_v20, %v286_v63  ;;  %v203_v37 = vmul.f32 %v202_v32, %v1180_v40  ;;  %vm293_vm2 = vweird.f32 %v937_v20  ;;  %v192_v2 = vmul.f32 %v191_v47, %v1180_v40  ;;  %v355_v47 = vld [vmem:[%s1563_s3 + $0x18] sm:$0xff] }
  0xbb   :  { %938 = vrcp.f32 %v1202_v18  ;;  %vm294_vm7 = vmor %vm292_vm5, %vm293_vm2  ;;  %v255_v39 = vsel %vm1222_vm6, %v1192_v61, %v251_v50  ;;  %v338_v62 = vand.u32 2147483648, %v1202_v18  ;;  %v336_v55 = vand.u32 2147483647, %v1202_v18 }
  0xbc   :  { %v289_v34 = vsub.f32 1.0, %v288_v29  ;;  %v204_v48 = vadd.f32 0.4994258, %v203_v37  ;;  %v260_v6 = vsel %vm1217_vm4, %v259_v23, %v255_v39  ;;  %v236_v61 = vmul.f32 %v235_v35, %v1129_v45  ;;  %v368_v39 = vpop.permute.xlu1 %367 }
  0xbd   :  { %vm332_vm10 = vweird.f32 %v1202_v18  ;;  %v339_v10 = vor.u32 1.1754944e-38, %v338_v62  ;;  %v193_v12 = vadd.f32 0.18741608, %v192_v2  ;;  %v316_v13 = vmul.f32 %v315_v58, %v1155_v9 }
  0xbe   :  { %v290_v41 = vmul.f32 %v937_v20, %v289_v34  ;;  %v205_v57 = vmul.f32 %v204_v48, %v1180_v40  ;;  %v261_v11 = vmul.f32 %v260_v6, %v236_v61  ;;  %vm337_vm12 = vcmp.eq.f32.partialorder %v336_v55, 8.507059e+37  ;;  %v378_v48 = vpop.permute.xlu2 %377 }
  0xbf   :  { %v194_v45 = vmul.f32 %v193_v12, %v1180_v40  ;;  %v178_v29 = vmul.f32 0.5, %v1135_v53  ;;  %v177_v40 = vmul.f32 0.5, %v1126_v43  ;;  %v352_v43 = vld [vmem:[%s1563_s3] sm:$0xff]  ;;  %vm380_vm1 = vcmask 261120  }
  0xc0   :  { %v291_v51 = vadd.f32 %v937_v20, %v290_v41  ;;  %v206_v3 = vadd.f32 1.0, %v205_v57 }
  0xc1   :  { %v939_v44 = vpop.eup %938  ;;  %v195_v9 = vadd.f32 1.1283791, %v194_v45 }
  0xc2   :  { %v328_v49 = vmul.f32 %v939_v44, %v1202_v18  ;;  %v295_v60 = vsel %vm294_vm7, %v937_v20, %v291_v51  ;;  %vm333_vm9 = vweird.f32 %v939_v44  ;;  %940 = vrcp.f32 %v206_v3 }
  0xc3   :  { %v300_v63 = vsel %vm297_vm8, %v299_v56, %v295_v60  ;;  %vm334_vm11 = vmor %vm332_vm10, %vm333_vm9  ;;  %v906_v20 = vclamps-f32 %v261_v11, 1.0  ;;  %v179_v18 = vmul.f32 0.5, %v1149_v5  ;;  %v218_v31 = vand.u32 2147483648, %v206_v3 }
  0xc4   :  { %v329_v59 = vsub.f32 1.0, %v328_v49  ;;  %v301_v8 = vmul.f32 %v300_v63, %v276_v54  ;;  %v216_v34 = vand.u32 2147483647, %v206_v3  ;;  %vm212_vm14 = vweird.f32 %v206_v3 }
  0xc5   :  { %v345_v30 = vadd.f32 1.0, %v906_v20  ;;  %v219_v5 = vor.u32 1.1754944e-38, %v218_v31  ;;  %v196_v50 = vmul.f32 %v195_v9, %v1168_v28  ;;  %v353_v28 = vld [vmem:[%s1563_s3 + $0x8] sm:$0xff] }
  0xc6   :  { %v330_v4 = vmul.f32 %v939_v44, %v329_v59  ;;  %v907_v17 = vclamps-f32 %v301_v8, 1.0  ;;  %vm217_vm0 = vcmp.eq.f32.partialorder %v216_v34, 8.507059e+37  ;;  %v363_v49 = vpop.permute.xlu2 %362 }
  0xc7   :  { %v349_v36 = vmul.f32 %v345_v30, %v177_v40 }
  0xc8   :  { %v331_v7 = vadd.f32 %v939_v44, %v330_v4  ;;  %v941_v19 = vpop.eup %940  ;;  %v346_v26 = vadd.f32 1.0, %v907_v17  ;;  %v373_v4 = vpop.permute.xlu0 %372 }
  0xc9   :  { %v208_v24 = vmul.f32 %v941_v19, %v206_v3  ;;  %vm213_vm13 = vweird.f32 %v941_v19 }
  0xca   :  { %v335_v14 = vsel %vm334_vm11, %v939_v44, %v331_v7  ;;  %v350_v35 = vmul.f32 %v346_v26, %v178_v29  ;;  %vm214_vm15 = vmor %vm212_vm14, %vm213_vm13 }
  0xcb   :  { %v340_v15 = vsel %vm337_vm12, %v339_v10, %v335_v14  ;;  %v209_v27 = vsub.f32 1.0, %v208_v24 }
  0xcc   :  { %v341_v16 = vmul.f32 %v340_v15, %v316_v13 }
  0xcd   :  { %v210_v33 = vmul.f32 %v941_v19, %v209_v27 }
  0xce   :  { %v908_v21 = vclamps-f32 %v341_v16, 1.0 }
  0xcf   :  { %v211_v0 = vadd.f32 %v941_v19, %v210_v33 }
  0xd0   :  { %v347_v25 = vadd.f32 1.0, %v908_v21 }
  0xd1   :  { %v215_v53 = vsel %vm214_vm15, %v941_v19, %v211_v0 }
  0xd2   :  { %v351_v32 = vmul.f32 %v347_v25, %v179_v18  ;;  %v220_v37 = vsel %vm217_vm0, %v219_v5, %v215_v53 }
  0xd3   :  { %v221_v38 = vmul.f32 %v220_v37, %v196_v50 }
  0xd4   :  { %405 = vmatpush.msra.mxu1 %v351_v32 }
  0xd5   :  { %v905_v41 = vclamps-f32 %v221_v38, 1.0 }
  0xd6   :  { %406 = vmatpush.msra.mxu1 %v350_v35 }
  0xd7   :  { %v344_v44 = vadd.f32 1.0, %v905_v41 }
  0xd8   :  { %407 = vmatpush.msra.mxu1 %v349_v36 }
  0xd9   :  { %v348_v46 = vmul.f32 %v344_v44, %v176_v42 }
  0xdb   :  { %408 = vmatpush.msra.mxu1 %v348_v46 }
  0xdc   :  { %909 = vmatmul.msk.f32.vlgmr.msra.gmra.mxu1 %vm380_vm1, %v352_v43 }
  0xe4   :  { %910 = vmatmul.msk.f32.gmra.mxu1 %vm380_vm1, %v353_v28 }
  0xec   :  { %911 = vmatmul.msk.f32.gmra.mxu1 %vm380_vm1, %v354_v22 }
  0xf4   :  { %912 = vmatmul.msk.f32.gmra.mxu1 %vm380_vm1, %v355_v47 }
 0x159   :  { %v410_v51 = vpop.f32.mrf.mxu1 }
 0x15a   :  { %v1261_v52 = vadd.f32 %v410_v51, %v363_v49 }
 0x15c   :  { %v1264_v23 = vmul.f32 0.70710677, %v1261_v52 }
 0x15e   :  { %v430_v54 = vmul.f32 %v1264_v23, %v1264_v23 }
 0x160   :  { %v1268_v56 = vmin.f32 %v430_v54, 16.0 }
 0x161   :  { %v413_v57 = vpop.f32.mrf.mxu1 }
 0x162   :  { %v1270_v58 = vadd.f32 %v413_v57, %v368_v39  ;;  %v443_v59 = vmul.f32 3.8918573e-05, %v1268_v56  ;;  %v432_v61 = vmul.f32 2.1237322e-06, %v1268_v56 }
 0x164   :  { %v1274_v60 = vmul.f32 0.70710677, %v1270_v58  ;;  %v444_v62 = vadd.f32 0.001143296, %v443_v59  ;;  %v433_v14 = vadd.f32 0.00028619796, %v432_v61 }
 0x166   :  { %v470_v63 = vmul.f32 %v1274_v60, %v1274_v60  ;;  %v445_v2 = vmul.f32 %v444_v62, %v1268_v56  ;;  %v434_v24 = vmul.f32 %v433_v14, %v1268_v56 }
 0x168   :  { %v1279_v3 = vmin.f32 %v470_v63, 16.0  ;;  %v446_v6 = vadd.f32 0.014752088, %v445_v2  ;;  %v435_v35 = vadd.f32 0.0036580483, %v434_v24 }
 0x169   :  { %v416_v55 = vpop.f32.mrf.mxu1 }
 0x16a   :  { %v1282_v7 = vadd.f32 %v416_v55, %v373_v4  ;;  %v483_v8 = vmul.f32 3.8918573e-05, %v1279_v3  ;;  %v447_v10 = vmul.f32 %v446_v6, %v1268_v56  ;;  %v472_v19 = vmul.f32 2.1237322e-06, %v1279_v3 }
 0x16b   :  { %v436_v44 = vmul.f32 %v435_v35, %v1268_v56 }
 0x16c   :  { %v1287_v11 = vmul.f32 0.70710677, %v1282_v7  ;;  %v484_v12 = vadd.f32 0.001143296, %v483_v8  ;;  %v448_v13 = vadd.f32 0.112945676, %v447_v10 }
 0x16d   :  { %v473_v9 = vadd.f32 0.00028619796, %v472_v19  ;;  %v437_v59 = vadd.f32 0.05243302, %v436_v44 }
 0x16e   :  { %v510_v15 = vmul.f32 %v1287_v11, %v1287_v11  ;;  %v485_v16 = vmul.f32 %v484_v12, %v1279_v3  ;;  %v449_v17 = vmul.f32 %v448_v13, %v1268_v56 }
 0x16f   :  { %v474_v53 = vmul.f32 %v473_v9, %v1279_v3  ;;  %v438_v8 = vmul.f32 %v437_v59, %v1268_v56 }
 0x170   :  { %v1294_v20 = vmin.f32 %v510_v15, 16.0  ;;  %v486_v21 = vadd.f32 0.014752088, %v485_v16  ;;  %v450_v29 = vadd.f32 0.4994258, %v449_v17 }
 0x171   :  { %v419_v45 = vpop.f32.mrf.mxu1  ;;  %v475_v49 = vadd.f32 0.0036580483, %v474_v53 }
 0x172   :  { %v1297_v18 = vadd.f32 %v419_v45, %v378_v48  ;;  %v512_v25 = vmul.f32 2.1237322e-06, %v1294_v20  ;;  %v523_v26 = vmul.f32 3.8918573e-05, %v1294_v20  ;;  %v487_v27 = vmul.f32 %v486_v21, %v1279_v3 }
 0x173   :  { %v451_v0 = vmul.f32 %v450_v29, %v1268_v56  ;;  %v476_v4 = vmul.f32 %v475_v49, %v1279_v3  ;;  %v439_v21 = vadd.f32 0.18741608, %v438_v8 }
 0x174   :  { %v1303_v30 = vmul.f32 0.70710677, %v1297_v18  ;;  %v513_v31 = vadd.f32 0.00028619796, %v512_v25  ;;  %v524_v32 = vadd.f32 0.001143296, %v523_v26 }
 0x175   :  { %v488_v34 = vadd.f32 0.112945676, %v487_v27  ;;  %v1318_v43 = vadd.f32 1.0, %v451_v0  ;;  %v477_v15 = vadd.f32 0.05243302, %v476_v4 }
 0x176   :  { %v550_v33 = vmul.f32 %v1303_v30, %v1303_v30  ;;  %v525_v40 = vmul.f32 %v524_v32, %v1294_v20  ;;  %v514_v5 = vmul.f32 %v513_v31, %v1294_v20  ;;  %v440_v32 = vmul.f32 %v439_v21, %v1268_v56 }
 0x177   :  { %v489_v50 = vmul.f32 %v488_v34, %v1279_v3  ;;  %942 = vrcp.f32 %v1318_v43  ;;  %v478_v29 = vmul.f32 %v477_v15, %v1279_v3  ;;  %vm458_vm2 = vweird.f32 %v1318_v43 }
 0x178   :  { %v1310_v36 = vmin.f32 %v550_v33, 16.0  ;;  %v526_v37 = vadd.f32 0.014752088, %v525_v40  ;;  %v515_v28 = vadd.f32 0.0036580483, %v514_v5 }
 0x179   :  { %v490_v42 = vadd.f32 0.4994258, %v489_v50  ;;  %v479_v5 = vadd.f32 0.18741608, %v478_v29  ;;  %v441_v53 = vadd.f32 1.1283791, %v440_v32 }
 0x17a   :  { %v552_v38 = vmul.f32 2.1237322e-06, %v1310_v36  ;;  %v563_v41 = vmul.f32 3.8918573e-05, %v1310_v36  ;;  %v527_v46 = vmul.f32 %v526_v37, %v1294_v20  ;;  %v516_v63 = vmul.f32 %v515_v28, %v1294_v20 }
 0x17b   :  { %v491_v48 = vmul.f32 %v490_v42, %v1279_v3  ;;  %v462_v56 = vand.u32 2147483647, %v1318_v43  ;;  %v480_v44 = vmul.f32 %v479_v5, %v1279_v3  ;;  %v425_v5 = vmul.f32 0.5, %v1297_v18  ;;  %v598_v18 = vld [vmem:[%s1565_s5] sm:$0xff] }
 0x17c   :  { %v553_v22 = vadd.f32 0.00028619796, %v552_v38  ;;  %v564_v47 = vadd.f32 0.001143296, %v563_v41  ;;  %v528_v51 = vadd.f32 0.112945676, %v527_v46 }
 0x17d   :  { %v1323_v57 = vadd.f32 1.0, %v491_v48  ;;  %v517_v12 = vadd.f32 0.05243302, %v516_v63  ;;  %v1333_v14 = vpop.eup %942  ;;  %vm463_vm14 = vcmp.eq.f32.partialorder %v462_v56, 8.507059e+37  ;;  %v422_v56 = vmul.f32 0.5, %v1261_v52  ;;  %v600_v52 = vld [vmem:[%s1565_s5 + $0x10] sm:$0xff] }
 0x17e   :  { %v554_v54 = vmul.f32 %v553_v22, %v1310_v36  ;;  %v565_v39 = vmul.f32 %v564_v47, %v1310_v36  ;;  %v529_v62 = vmul.f32 %v528_v51, %v1294_v20  ;;  %v454_v27 = vmul.f32 %v1333_v14, %v1318_v43 }
 0x17f   :  { %944 = vrcp.f32 %v1323_v57  ;;  %v518_v24 = vmul.f32 %v517_v12, %v1294_v20  ;;  %v464_v22 = vand.u32 2147483648, %v1318_v43  ;;  %v502_v48 = vand.u32 2147483647, %v1323_v57 }
 0x180   :  { %v566_v2 = vadd.f32 0.014752088, %v565_v39  ;;  %v555_v55 = vadd.f32 0.0036580483, %v554_v54  ;;  %v530_v6 = vadd.f32 0.4994258, %v529_v62  ;;  %vm498_vm5 = vweird.f32 %v1323_v57 }
 0x181   :  { %v519_v34 = vadd.f32 0.18741608, %v518_v24  ;;  %v455_v40 = vsub.f32 1.0, %v454_v27  ;;  %v504_v49 = vand.u32 2147483648, %v1323_v57  ;;  %vm459_vm6 = vweird.f32 %v1333_v14 }
 0x182   :  { %v567_v61 = vmul.f32 %v566_v2, %v1310_v36  ;;  %v531_v10 = vmul.f32 %v530_v6, %v1294_v20  ;;  %v556_v16 = vmul.f32 %v555_v55, %v1310_v36  ;;  %v481_v55 = vadd.f32 1.1283791, %v480_v44  ;;  %vm1380_vm12 = vmor %vm458_vm2, %vm459_vm6 }
 0x183   :  { %v520_v41 = vmul.f32 %v519_v34, %v1294_v20  ;;  %v456_v42 = vmul.f32 %v1333_v14, %v455_v40  ;;  %vm503_vm10 = vcmp.eq.f32.partialorder %v502_v48, 8.507059e+37  ;;  %v465_v43 = vor.u32 1.1754944e-38, %v464_v22 }
 0x184   :  { %v568_v13 = vadd.f32 0.112945676, %v567_v61  ;;  %v532_v17 = vadd.f32 1.0, %v531_v10  ;;  %v557_v9 = vadd.f32 0.05243302, %v556_v16  ;;  %v482_v24 = vmul.f32 %v481_v55, %v1274_v60 }
 0x185   :  { %v1336_v19 = vpop.eup %944  ;;  %v521_v59 = vadd.f32 1.1283791, %v520_v41  ;;  %v457_v3 = vadd.f32 %v1333_v14, %v456_v42 }
 0x186   :  { %v569_v45 = vmul.f32 %v568_v13, %v1310_v36  ;;  %946 = vrcp.f32 %v532_v17  ;;  %v494_v26 = vmul.f32 %v1336_v19, %v1323_v57  ;;  %v558_v50 = vmul.f32 %v557_v9, %v1310_v36 }
 0x187   :  { %v544_v47 = vand.u32 2147483648, %v532_v17  ;;  %vm499_vm3 = vweird.f32 %v1336_v19  ;;  %v542_v51 = vand.u32 2147483647, %v532_v17  ;;  %vm538_vm7 = vweird.f32 %v532_v17 }
 0x188   :  { %v570_v25 = vadd.f32 0.4994258, %v569_v45  ;;  %v495_v33 = vsub.f32 1.0, %v494_v26  ;;  %v559_v46 = vadd.f32 0.18741608, %v558_v50  ;;  %vm1369_vm8 = vmor %vm498_vm5, %vm499_vm3  ;;  %v505_v57 = vor.u32 1.1754944e-38, %v504_v49 }
 0x189   :  { %v545_v6 = vor.u32 1.1754944e-38, %v544_v47  ;;  %vm543_vm11 = vcmp.eq.f32.partialorder %v542_v51, 8.507059e+37  ;;  %v522_v12 = vmul.f32 %v521_v59, %v1287_v11  ;;  %v461_v16 = vsel %vm1380_vm12, %v1333_v14, %v457_v3 }
 0x18a   :  { %v571_v31 = vmul.f32 %v570_v25, %v1310_v36  ;;  %v496_v38 = vmul.f32 %v1336_v19, %v495_v33  ;;  %v560_v62 = vmul.f32 %v559_v46, %v1310_v36  ;;  %v442_v26 = vmul.f32 %v441_v53, %v1264_v23 }
 0x18b   :  { %v466_v29 = vsel %vm463_vm14, %v465_v43, %v461_v16  ;;  %v424_v23 = vmul.f32 0.5, %v1282_v7  ;;  %v601_v7 = vld [vmem:[%s1565_s5 + $0x18] sm:$0xff] }
 0x18c   :  { %v1347_v35 = vadd.f32 1.0, %v571_v31  ;;  %v947_v0 = vpop.eup %946  ;;  %v497_v54 = vadd.f32 %v1336_v19, %v496_v38  ;;  %v467_v40 = vmul.f32 %v466_v29, %v442_v26 }
 0x18d   :  { %v534_v37 = vmul.f32 %v947_v0, %v532_v17  ;;  %vm539_vm4 = vweird.f32 %v947_v0  ;;  %v561_v17 = vadd.f32 1.1283791, %v560_v62 }
 0x18e   :  { %948 = vrcp.f32 %v1347_v35  ;;  %vm540_vm9 = vmor %vm538_vm7, %vm539_vm4  ;;  %v501_v36 = vsel %vm1369_vm8, %v1336_v19, %v497_v54  ;;  %v584_v13 = vand.u32 2147483648, %v1347_v35  ;;  %v582_v19 = vand.u32 2147483647, %v1347_v35  ;;  %v614_v54 = vpop.permute.xlu2 %613 }
 0x18f   :  { %v535_v28 = vsub.f32 1.0, %v534_v37  ;;  %v506_v21 = vsel %vm503_vm10, %v505_v57, %v501_v36  ;;  %vm578_vm15 = vweird.f32 %v1347_v35  ;;  %v562_v14 = vmul.f32 %v561_v17, %v1303_v30 }
 0x190   :  { %v585_v27 = vor.u32 1.1754944e-38, %v584_v13  ;;  %vm583_vm2 = vcmp.eq.f32.partialorder %v582_v19, 8.507059e+37  ;;  %v507_v31 = vmul.f32 %v506_v21, %v482_v24  ;;  %v913_v37 = vclamps-f32 %v467_v40, 1.0 }
 0x191   :  { %v536_v20 = vmul.f32 %v947_v0, %v535_v28  ;;  %v423_v30 = vmul.f32 0.5, %v1270_v58  ;;  %v599_v58 = vld [vmem:[%s1565_s5 + $0x8] sm:$0xff]  ;;  %v624_v28 = vpop.permute.xlu0 %623 }
 0x192   :  { %v914_v60 = vclamps-f32 %v507_v31, 1.0  ;;  %v590_v42 = vadd.f32 1.0, %v913_v37 }
 0x193   :  { %v537_v2 = vadd.f32 %v947_v0, %v536_v20 }
 0x194   :  { %v949_v39 = vpop.eup %948  ;;  %v591_v38 = vadd.f32 1.0, %v914_v60  ;;  %v594_v46 = vmul.f32 %v590_v42, %v422_v56 }
 0x195   :  { %v574_v63 = vmul.f32 %v949_v39, %v1347_v35  ;;  %v541_v8 = vsel %vm540_vm9, %v947_v0, %v537_v2  ;;  %vm579_vm13 = vweird.f32 %v949_v39 }
 0x196   :  { %v546_v15 = vsel %vm543_vm11, %v545_v6, %v541_v8  ;;  %vm580_vm0 = vmor %vm578_vm15, %vm579_vm13  ;;  %v595_v44 = vmul.f32 %v591_v38, %v423_v30  ;;  %v619_v6 = vpop.permute.xlu1 %618 }
 0x197   :  { %v575_v61 = vsub.f32 1.0, %v574_v63  ;;  %v547_v11 = vmul.f32 %v546_v15, %v522_v12 }
 0x199   :  { %v576_v45 = vmul.f32 %v949_v39, %v575_v61  ;;  %v915_v34 = vclamps-f32 %v547_v11, 1.0  ;;  %v609_v22 = vpop.permute.xlu0 %608 }
 0x19b   :  { %v577_v25 = vadd.f32 %v949_v39, %v576_v45  ;;  %v592_v50 = vadd.f32 1.0, %v915_v34 }
 0x19d   :  { %v581_v9 = vsel %vm580_vm0, %v949_v39, %v577_v25  ;;  %v596_v41 = vmul.f32 %v592_v50, %v424_v23 }
 0x19e   :  { %v586_v32 = vsel %vm583_vm2, %v585_v27, %v581_v9 }
 0x19f   :  { %v587_v33 = vmul.f32 %v586_v32, %v562_v14 }
 0x1a1   :  { %v916_v0 = vclamps-f32 %v587_v33, 1.0 }
 0x1a3   :  { %v593_v35 = vadd.f32 1.0, %v916_v0 }
 0x1a5   :  { %v597_v53 = vmul.f32 %v593_v35, %v425_v5 }
 0x1a7   :  { %650 = vmatpush.msra.mxu2 %v597_v53 }
 0x1a9   :  { %651 = vmatpush.msra.mxu2 %v596_v41 }
 0x1ab   :  { %652 = vmatpush.msra.mxu2 %v595_v44 }
 0x1ad   :  { %653 = vmatpush.msra.mxu2 %v594_v46 }
 0x1ae   :  { %917 = vmatmul.msk.f32.vlgmr.msra.gmra.mxu2 %vm380_vm1, %v598_v18 }
 0x1b6   :  { %918 = vmatmul.msk.f32.gmra.mxu2 %vm380_vm1, %v599_v58 }
 0x1be   :  { %919 = vmatmul.msk.f32.gmra.mxu2 %vm380_vm1, %v600_v52 }
 0x1c6   :  { %920 = vmatmul.msk.f32.gmra.mxu2 %vm380_vm1, %v601_v7 }
 0x231   :  { %v655_v47 = vpop.f32.mrf.mxu2 }
 0x232   :  { %v1414_v48 = vadd.f32 %v655_v47, %v609_v22 }
 0x234   :  { %v1417_v49 = vmul.f32 0.70710677, %v1414_v48 }
 0x236   :  { %v675_v20 = vmul.f32 %v1417_v49, %v1417_v49 }
 0x238   :  { %v1421_v51 = vmin.f32 %v675_v20, 16.0 }
 0x239   :  { %v658_v39 = vpop.f32.mrf.mxu2 }
 0x23a   :  { %v1423_v59 = vadd.f32 %v658_v39, %v614_v54  ;;  %v688_v3 = vmul.f32 3.8918573e-05, %v1421_v51  ;;  %v677_v12 = vmul.f32 2.1237322e-06, %v1421_v51 }
 0x23c   :  { %v1427_v62 = vmul.f32 0.70710677, %v1423_v59  ;;  %v689_v63 = vadd.f32 0.001143296, %v688_v3  ;;  %v678_v21 = vadd.f32 0.00028619796, %v677_v12 }
 0x23e   :  { %v715_v2 = vmul.f32 %v1427_v62, %v1427_v62  ;;  %v690_v4 = vmul.f32 %v689_v63, %v1421_v51  ;;  %v679_v31 = vmul.f32 %v678_v21, %v1421_v51 }
 0x240   :  { %v1432_v55 = vmin.f32 %v715_v2, 16.0  ;;  %v691_v61 = vadd.f32 0.014752088, %v690_v4  ;;  %v680_v50 = vadd.f32 0.0036580483, %v679_v31 }
 0x241   :  { %v661_v57 = vpop.f32.mrf.mxu2 }
 0x242   :  { %v1434_v8 = vadd.f32 %v661_v57, %v619_v6  ;;  %v728_v36 = vmul.f32 3.8918573e-05, %v1432_v55  ;;  %v692_v10 = vmul.f32 %v691_v61, %v1421_v51  ;;  %v717_v11 = vmul.f32 2.1237322e-06, %v1432_v55 }
 0x243   :  { %v681_v18 = vmul.f32 %v680_v50, %v1421_v51 }
 0x244   :  { %v1440_v13 = vmul.f32 0.70710677, %v1434_v8  ;;  %v729_v15 = vadd.f32 0.001143296, %v728_v36  ;;  %v693_v16 = vadd.f32 0.112945676, %v692_v10 }
 0x245   :  { %v718_v40 = vadd.f32 0.00028619796, %v717_v11  ;;  %v682_v3 = vadd.f32 0.05243302, %v681_v18 }
 0x246   :  { %v755_v17 = vmul.f32 %v1440_v13, %v1440_v13  ;;  %v730_v45 = vmul.f32 %v729_v15, %v1432_v55  ;;  %v694_v19 = vmul.f32 %v693_v16, %v1421_v51 }
 0x247   :  { %v719_v30 = vmul.f32 %v718_v40, %v1432_v55  ;;  %v683_v10 = vmul.f32 %v682_v3, %v1421_v51 }
 0x248   :  { %v1446_v43 = vmin.f32 %v755_v17, 16.0  ;;  %v731_v25 = vadd.f32 0.014752088, %v730_v45  ;;  %v695_v9 = vadd.f32 0.4994258, %v694_v19 }
 0x249   :  { %v664_v24 = vpop.f32.mrf.mxu2  ;;  %v720_v22 = vadd.f32 0.0036580483, %v719_v30  ;;  %v684_v11 = vadd.f32 0.18741608, %v683_v10 }
 0x24a   :  { %v1449_v26 = vadd.f32 %v664_v24, %v624_v28  ;;  %v757_v27 = vmul.f32 2.1237322e-06, %v1446_v43  ;;  %v768_v29 = vmul.f32 3.8918573e-05, %v1446_v43  ;;  %v732_v14 = vmul.f32 %v731_v25, %v1432_v55 }
 0x24b   :  { %v696_v35 = vmul.f32 %v695_v9, %v1421_v51  ;;  %v721_v6 = vmul.f32 %v720_v22, %v1432_v55  ;;  %v685_v40 = vmul.f32 %v684_v11, %v1421_v51 }
 0x24c   :  { %v758_v32 = vadd.f32 0.00028619796, %v757_v27  ;;  %v1456_v33 = vmul.f32 0.70710677, %v1449_v26  ;;  %v769_v34 = vadd.f32 0.001143296, %v768_v29 }
 0x24d   :  { %v733_v0 = vadd.f32 0.112945676, %v732_v14  ;;  %v1470_v46 = vadd.f32 1.0, %v696_v35  ;;  %v722_v19 = vadd.f32 0.05243302, %v721_v6 }
 0x24e   :  { %v795_v60 = vmul.f32 %v1456_v33, %v1456_v33  ;;  %v770_v5 = vmul.f32 %v769_v34, %v1446_v43  ;;  %v759_v23 = vmul.f32 %v758_v32, %v1446_v43 }
 0x24f   :  { %v734_v37 = vmul.f32 %v733_v0, %v1432_v55  ;;  %950 = vrcp.f32 %v1470_v46  ;;  %v723_v31 = vmul.f32 %v722_v19, %v1432_v55  ;;  %vm703_vm3 = vweird.f32 %v1470_v46 }
 0x250   :  { %v1464_v53 = vmin.f32 %v795_v60, 16.0  ;;  %v771_v38 = vadd.f32 0.014752088, %v770_v5  ;;  %v760_v52 = vadd.f32 0.0036580483, %v759_v23  ;;  %v709_v51 = vand.u32 2147483648, %v1470_v46 }
 0x251   :  { %v735_v41 = vadd.f32 0.4994258, %v734_v37  ;;  %v724_v37 = vadd.f32 0.18741608, %v723_v31 }
 0x252   :  { %v797_v42 = vmul.f32 2.1237322e-06, %v1464_v53  ;;  %v808_v56 = vmul.f32 3.8918573e-05, %v1464_v53  ;;  %v772_v44 = vmul.f32 %v771_v38, %v1446_v43  ;;  %v761_v2 = vmul.f32 %v760_v52, %v1446_v43 }
 0x253   :  { %v736_v58 = vmul.f32 %v735_v41, %v1432_v55  ;;  %v686_v38 = vadd.f32 1.1283791, %v685_v40  ;;  %v707_v52 = vand.u32 2147483647, %v1470_v46 }
 0x254   :  { %v798_v7 = vadd.f32 0.00028619796, %v797_v42  ;;  %v809_v28 = vadd.f32 0.001143296, %v808_v56  ;;  %v773_v47 = vadd.f32 0.112945676, %v772_v44  ;;  %v725_v44 = vmul.f32 %v724_v37, %v1432_v55 }
 0x255   :  { %v1474_v20 = vadd.f32 1.0, %v736_v58  ;;  %v1486_v15 = vpop.eup %950  ;;  %v762_v16 = vadd.f32 0.05243302, %v761_v2  ;;  %vm708_vm15 = vcmp.eq.f32.partialorder %v707_v52, 8.507059e+37  ;;  %v670_v37 = vmul.f32 0.5, %v1449_v26  ;;  %v843_v26 = vld [vmem:[%s1567_s7] sm:$0xff] }
 0x256   :  { %v799_v54 = vmul.f32 %v798_v7, %v1464_v53  ;;  %v810_v39 = vmul.f32 %v809_v28, %v1464_v53  ;;  %v774_v63 = vmul.f32 %v773_v47, %v1446_v43  ;;  %v699_v9 = vmul.f32 %v1486_v15, %v1470_v46  ;;  %s886_s7 = sshll.u32 %s985_s28, 4  ;;  %s887_s7 = int_to_ptr.vmem [resolvable:$true] %s886_s7 }
 0x257   :  { %952 = vrcp.f32 %v1474_v20  ;;  %v763_v29 = vmul.f32 %v762_v16, %v1446_v43  ;;  %v747_v28 = vand.u32 2147483647, %v1474_v20  ;;  %v749_v22 = vand.u32 2147483648, %v1474_v20 }
 0x258   :  { %v811_v4 = vadd.f32 0.014752088, %v810_v39  ;;  %v800_v57 = vadd.f32 0.0036580483, %v799_v54  ;;  %v775_v61 = vadd.f32 0.4994258, %v774_v63  ;;  %vm743_vm6 = vweird.f32 %v1474_v20 }
 0x259   :  { %v764_v60 = vadd.f32 0.18741608, %v763_v29  ;;  %v700_v35 = vsub.f32 1.0, %v699_v9  ;;  %vm704_vm7 = vweird.f32 %v1486_v15  ;;  %vm748_vm11 = vcmp.eq.f32.partialorder %v747_v28, 8.507059e+37 }
 0x25a   :  { %v812_v36 = vmul.f32 %v811_v4, %v1464_v53  ;;  %v776_v12 = vmul.f32 %v775_v61, %v1446_v43  ;;  %v801_v21 = vmul.f32 %v800_v57, %v1464_v53  ;;  %v726_v57 = vadd.f32 1.1283791, %v725_v44  ;;  %vm1533_vm13 = vmor %vm703_vm3, %vm704_vm7 }
 0x25b   :  { %v765_v42 = vmul.f32 %v764_v60, %v1446_v43  ;;  %v701_v56 = vmul.f32 %v1486_v15, %v700_v35  ;;  %v710_v46 = vor.u32 1.1754944e-38, %v709_v51  ;;  %v667_v51 = vmul.f32 0.5, %v1414_v48 }
 0x25c   :  { %v813_v17 = vadd.f32 0.112945676, %v812_v36  ;;  %v777_v24 = vadd.f32 1.0, %v776_v12  ;;  %v802_v32 = vadd.f32 0.05243302, %v801_v21  ;;  %v873_v28 = vlaneseq }
 0x25d   :  { %v1488_v45 = vpop.eup %952  ;;  %v766_v3 = vadd.f32 1.1283791, %v765_v42  ;;  %v702_v55 = vadd.f32 %v1486_v15, %v701_v56 }
 0x25e   :  { %v814_v25 = vmul.f32 %v813_v17, %v1464_v53  ;;  %954 = vrcp.f32 %v777_v24  ;;  %v739_v27 = vmul.f32 %v1488_v45, %v1474_v20  ;;  %v803_v23 = vmul.f32 %v802_v32, %v1464_v53 }
 0x25f   :  { %v789_v7 = vand.u32 2147483648, %v777_v24  ;;  %vm744_vm4 = vweird.f32 %v1488_v45  ;;  %v787_v47 = vand.u32 2147483647, %v777_v24  ;;  %vm783_vm8 = vweird.f32 %v777_v24 }
 0x260   :  { %v815_v14 = vadd.f32 0.4994258, %v814_v25  ;;  %v740_v0 = vsub.f32 1.0, %v739_v27  ;;  %v804_v18 = vadd.f32 0.18741608, %v803_v23  ;;  %vm1522_vm9 = vmor %vm743_vm6, %vm744_vm4  ;;  %v750_v20 = vor.u32 1.1754944e-38, %v749_v22  ;;  %v848_v22 = vpop.permute.xlu1 %847 }
 0x261   :  { %v790_v61 = vor.u32 1.1754944e-38, %v789_v7  ;;  %vm788_vm12 = vcmp.eq.f32.partialorder %v787_v47, 8.507059e+37  ;;  %v767_v16 = vmul.f32 %v766_v3, %v1440_v13  ;;  %v706_v21 = vsel %vm1533_vm13, %v1486_v15, %v702_v55 }
 0x262   :  { %v816_v34 = vmul.f32 %v815_v14, %v1464_v53  ;;  %v741_v41 = vmul.f32 %v1488_v45, %v740_v0  ;;  %v805_v63 = vmul.f32 %v804_v18, %v1464_v53  ;;  %v727_v27 = vmul.f32 %v726_v57, %v1427_v62 }
 0x263   :  { %v687_v14 = vmul.f32 %v686_v38, %v1417_v49  ;;  %v711_v31 = vsel %vm708_vm15, %v710_v46, %v706_v21  ;;  %v669_v49 = vmul.f32 0.5, %v1434_v8  ;;  %v160_v8 = vrot.slane %v1147_v1, 4 }
 0x264   :  { %v1500_v5 = vadd.f32 1.0, %v816_v34  ;;  %v955_v50 = vpop.eup %954  ;;  %v742_v54 = vadd.f32 %v1488_v45, %v741_v41  ;;  %v874_v47 = vshrl.u32 %v873_v28, 7  ;;  %v986_v3 = vmov 1.0  }
 0x265   :  { %v779_v30 = vmul.f32 %v955_v50, %v777_v24  ;;  %vm784_vm5 = vweird.f32 %v955_v50  ;;  %v806_v24 = vadd.f32 1.1283791, %v805_v63  ;;  %v712_v35 = vmul.f32 %v711_v31, %v687_v14 }
 0x266   :  { %956 = vrcp.f32 %v1500_v5  ;;  %vm785_vm10 = vmor %vm783_vm8, %vm784_vm5  ;;  %v746_v53 = vsel %vm1522_vm9, %v1488_v45, %v742_v54  ;;  %v829_v17 = vand.u32 2147483648, %v1500_v5  ;;  %v827_v45 = vand.u32 2147483647, %v1500_v5 }
 0x267   :  { %v780_v58 = vsub.f32 1.0, %v779_v30  ;;  %v751_v11 = vsel %vm748_vm11, %v750_v20, %v746_v53  ;;  %vm823_vm0 = vweird.f32 %v1500_v5  ;;  %v807_v15 = vmul.f32 %v806_v24, %v1456_v33 }
 0x268   :  { %v830_v9 = vor.u32 1.1754944e-38, %v829_v17  ;;  %vm828_vm3 = vcmp.eq.f32.partialorder %v827_v45, 8.507059e+37  ;;  %v752_v34 = vmul.f32 %v751_v11, %v727_v27  ;;  %v921_v30 = vclamps-f32 %v712_v35, 1.0 }
 0x269   :  { %v781_v43 = vmul.f32 %v955_v50, %v780_v58  ;;  %v668_v33 = vmul.f32 0.5, %v1423_v59  ;;  %v161_v59 = vadd.f32 %v160_v8, %v1147_v1 }
 0x26a   :  { %v922_v62 = vclamps-f32 %v752_v34, 1.0  ;;  %v835_v56 = vadd.f32 1.0, %v921_v30 }
 0x26b   :  { %v782_v4 = vadd.f32 %v955_v50, %v781_v43  ;;  %v162_v58 = vrot.slane %v161_v59, 2 }
 0x26c   :  { %v957_v39 = vpop.eup %956  ;;  %v836_v41 = vadd.f32 1.0, %v922_v62  ;;  %v839_v18 = vmul.f32 %v835_v56, %v667_v51 }
 0x26d   :  { %v819_v2 = vmul.f32 %v957_v39, %v1500_v5  ;;  %v786_v10 = vsel %vm785_vm10, %v955_v50, %v782_v4  ;;  %vm824_vm14 = vweird.f32 %v957_v39  ;;  %v163_v52 = vadd.f32 %v162_v58, %v161_v59 }
 0x26e   :  { %v791_v19 = vsel %vm788_vm12, %v790_v61, %v786_v10  ;;  %vm825_vm2 = vmor %vm823_vm0, %vm824_vm14  ;;  %v840_v44 = vmul.f32 %v836_v41, %v668_v33 }
 0x26f   :  { %v820_v36 = vsub.f32 1.0, %v819_v2  ;;  %v792_v13 = vmul.f32 %v791_v19, %v767_v16  ;;  %v164_v7 = vrot.slane %v163_v52, 1 }
 0x271   :  { %v821_v25 = vmul.f32 %v957_v39, %v820_v36  ;;  %v923_v60 = vclamps-f32 %v792_v13, 1.0  ;;  %v165_v48 = vadd.f32 %v164_v7, %v163_v52 }
 0x273   :  { %v822_v29 = vadd.f32 %v957_v39, %v821_v25  ;;  %v837_v23 = vadd.f32 1.0, %v923_v60  ;;  %vm166_vm4 = vcmp.lt.f32.partialorder %v165_v48, 0.0 }
 0x274   :  { %v167_v55 = vsel %vm166_vm4, -1.0, %v986_v3 }
 0x275   :  { %v826_v32 = vsel %vm825_vm2, %v957_v39, %v822_v29  ;;  %v841_v42 = vmul.f32 %v837_v23, %v669_v49 }
 0x276   :  { %v831_v40 = vsel %vm828_vm3, %v830_v9, %v826_v32 }
 0x277   :  { %v832_v0 = vmul.f32 %v831_v40, %v807_v15 }
 0x279   :  { %v924_v50 = vclamps-f32 %v832_v0, 1.0 }
 0x27b   :  { %v838_v5 = vadd.f32 1.0, %v924_v50 }
 0x27d   :  { %v842_v38 = vmul.f32 %v838_v5, %v670_v37 }
 0x27f   :  { %865 = vmatpush.msrb.mxu3 %v842_v38 }
 0x281   :  { %866 = vmatpush.msrb.mxu3 %v841_v42 }
 0x283   :  { %867 = vmatpush.msrb.mxu3 %v840_v44 }
 0x285   :  { %868 = vmatpush.msrb.mxu3 %v839_v18 }
 0x286   :  { %925 = vmatmul.msk.f32.vlgmr.msrb.gmra.mxu3 %vm380_vm1, %v843_v26  ;;  %vm875_vm1 = vcmp.lt.s32.totalorder %v874_v47, 4 }
 0x309   :  { %v870_v43 = vpop.f32.mrf.mxu3 }
 0x30a   :  { %v871_v54 = vadd.f32 %v870_v43, %v848_v22 }
 0x30c   :  { %v877_v39 = vmax.f32 %v871_v54, -20.0  ;;  %v876_v1 = vmul.f32 %v871_v54, %v167_v55 }
 0x30e   :  { %v878_v63 = vmin.f32 %v877_v39, 2.0 }
 0x310   :  { %v879_v2 = vsel %vm875_vm1, %v876_v1, %v878_v63 }
 0x311   :  { %880 = vst [vmem:[#allocation2] sm:$0xff] %v879_v2 }
 0x312   :  { %891 = dma.vmem_to_hbm [thread:$0]  %s887_s7, 128, %s889_s10, [#allocation3]  }
 0x313   :  { %982 = dma.done.wait [#allocation3], 128  }
 0x314   :  { %983 = vsyncadd [#allocation3], 4294967168 }
 0x315   :  { %896 = vsyncpa [#allocation3], 1 }

</bundles_post_ra>
